<compile_context>
chip_gen: v7x
topology: tpu7x:2x2x1
jax: 0.10.0
libtpu: 0.0.40
codegen_flags: <defaults>
</compile_context>

<pallas_src>
import functools

import jax
import jax.numpy as jnp
from jax import lax
from jax.experimental import pallas as pl
from jax.experimental.pallas import tpu as pltpu

BN_EPS = 1e-5
LANE = 128
SUBLANE = 8


def _round_up(x, m):
    return (x + m - 1) // m * m


def _cdiv(a, b):
    return -(-a // b)


def _pad2d(a, rows, cols):
    a = a.astype(jnp.float32)
    return jnp.pad(a, ((0, rows - a.shape[0]), (0, cols - a.shape[1])))


def _vmem_limit_bytes():
    """Scoped-VMEM limit: ~3/4 of physical VMEM, clamped to [32 MiB, 100 MiB]."""
    phys = 64 * 1024 * 1024  # conservative fallback (v7x physical VMEM per core)
    try:
        info = pltpu.get_tpu_info()
        cap = int(getattr(info, "vmem_capacity_bytes", phys))
        if cap > 0:
            phys = cap
    except Exception:
        pass
    return max(32 * 1024 * 1024, min(phys * 3 // 4, 100 * 1024 * 1024))


# ---------------------------------------------------------------------------
# Fused path: everything resident in VMEM, single kernel invocation.
# ---------------------------------------------------------------------------
def _fused_kernel(x_ref, w1_ref, b1_ref, gamma_ref, beta_ref, w2_ref, b2_ref,
                  o_ref, *, n_valid, mm_dtype):
    h = jnp.dot(x_ref[...].astype(mm_dtype), w1_ref[...].astype(mm_dtype),
                preferred_element_type=jnp.float32)
    h = jnp.maximum(h + b1_ref[...], 0.0)                       # ReLU (f32)

    rows = h.shape[0]
    if rows != n_valid:                                         # static: mask pad rows
        row = lax.broadcasted_iota(jnp.int32, (rows, 1), 0)
        h_stat = jnp.where(row < n_valid, h, 0.0)
    else:
        h_stat = h

    inv_n = jnp.float32(1.0 / n_valid)
    mean = jnp.sum(h_stat, axis=0, keepdims=True) * inv_n       # (1, Hp)
    var = jnp.sum(h_stat * h_stat, axis=0, keepdims=True) * inv_n - mean * mean
    var = jnp.maximum(var, 0.0)
    scale = gamma_ref[...] * lax.rsqrt(var + BN_EPS)            # (1, Hp)
    shift = beta_ref[...] - mean * scale

    hn = h * scale + shift                                      # BN with batch stats
    z = jnp.dot(hn.astype(mm_dtype), w2_ref[...].astype(mm_dtype),
                preferred_element_type=jnp.float32) + b2_ref[...]
    o_ref[...] = jax.nn.sigmoid(z)                              # exp/recip on the EUP


# ---------------------------------------------------------------------------
# Pass 1: h = relu(x @ W1 + b1), per-tile partial BN statistics ("parallel").
# ---------------------------------------------------------------------------
def _pass1_kernel(x_ref, w1_ref, b1_ref, h_ref, sum_ref, sq_ref, *,
                  n_valid, tile_n, mask_from, mm_dtype):
    i = pl.program_id(0)
    h = jnp.dot(x_ref[...].astype(mm_dtype), w1_ref[...].astype(mm_dtype),
                preferred_element_type=jnp.float32)
    h = jnp.maximum(h + b1_ref[...], 0.0)
    h_ref[...] = h.astype(h_ref.dtype)          # bf16 store when matmul_dtype=bf16

    def _stats(hh):
        s = jnp.sum(hh, axis=0, keepdims=True)                  # (1, Hp)
        q = jnp.sum(hh * hh, axis=0, keepdims=True)             # (1, Hp)
        # Broadcast into the (8, Hp) partial block (keeps blocks (8,128)-aligned);
        # the wrapper reads row 0 of every block.
        sum_ref[...] = jnp.broadcast_to(s, (SUBLANE, s.shape[1]))
        sq_ref[...] = jnp.broadcast_to(q, (SUBLANE, q.shape[1]))

    if mask_from is None:                        # static: no padded rows anywhere
        _stats(h)
    else:
        @pl.when(i < mask_from)                  # unmasked fast path
        def _():
            _stats(h)

        @pl.when(i >= mask_from)                 # only tiles with padded rows pay the mask
        def _():
            row = i * tile_n + lax.broadcasted_iota(jnp.int32, (tile_n, 1), 0)
            _stats(jnp.where(row < n_valid, h, 0.0))


# ---------------------------------------------------------------------------
# Pass 2: z = h @ w2_folded + b2_folded -> sigmoid (BN already folded into W2).
# ---------------------------------------------------------------------------
def _pass2_kernel(h_ref, w2f_ref, b2f_ref, o_ref, *, mm_dtype):
    z = jnp.dot(h_ref[...].astype(mm_dtype), w2f_ref[...].astype(mm_dtype),
                preferred_element_type=jnp.float32) + b2f_ref[...]
    o_ref[...] = jax.nn.sigmoid(z)


# ---------------------------------------------------------------------------
# Wrapper
# ---------------------------------------------------------------------------
def simple_logistic_forward(x, w1, b1, gamma, beta, w2, b2, *,
                            batch_tile=4096, matmul_dtype=jnp.float32,
                            force_two_pass=False):
    """Forward pass. Weights stored as (in_features, out_features)."""
    N, D_in = x.shape
    H = w1.shape[1]
    D_out = w2.shape[1]

    Dp = _round_up(D_in, LANE)
    Hp = _round_up(H, LANE)
    Op = _round_up(D_out, LANE)

    h_dtype = jnp.bfloat16 if matmul_dtype == jnp.bfloat16 else jnp.float32
    h_bytes = jnp.dtype(h_dtype).itemsize

    w1p = _pad2d(w1, Dp, Hp)
    b1p = _pad2d(b1.reshape(1, -1), 1, Hp)
    gp = _pad2d(gamma.reshape(1, -1), 1, Hp)
    btp = _pad2d(beta.reshape(1, -1), 1, Hp)
    w2p = _pad2d(w2, Hp, Op)
    b2p = _pad2d(b2.reshape(1, -1), 1, Op)

    vmem_limit = _vmem_limit_bytes()

    # ---------------- fused single-call path (small / medium problems) -------------
    Np8 = _round_up(N, SUBLANE)
    fused_bytes = 4 * (Np8 * (Dp + 3 * Hp + 2 * Op)             # x, h (+temps), out
                       + Dp * Hp + Hp * Op + 8 * Hp + 2 * Op)   # weights + vectors
    if (not force_two_pass) and fused_bytes <= vmem_limit // 2:
        xp = _pad2d(x, Np8, Dp)
        cost = pl.CostEstimate(
            flops=2 * Np8 * Hp * (Dp + Op) + 8 * Np8 * Hp,
            transcendentals=Np8 * Op + 2 * Hp,
            bytes_accessed=4 * (Np8 * Dp + Dp * Hp + Hp * Op + Np8 * Op + 4 * Hp + 2 * Op),
        )
        out_pad = pl.pallas_call(
            functools.partial(_fused_kernel, n_valid=N, mm_dtype=matmul_dtype),
            grid=(1,),
            in_specs=[
                pl.BlockSpec((Np8, Dp), lambda i: (0, 0)),
                pl.BlockSpec((Dp, Hp), lambda i: (0, 0)),
                pl.BlockSpec((1, Hp), lambda i: (0, 0)),
                pl.BlockSpec((1, Hp), lambda i: (0, 0)),
                pl.BlockSpec((1, Hp), lambda i: (0, 0)),
                pl.BlockSpec((Hp, Op), lambda i: (0, 0)),
                pl.BlockSpec((1, Op), lambda i: (0, 0)),
            ],
            out_specs=pl.BlockSpec((Np8, Op), lambda i: (0, 0)),   # lane-dense slab
            out_shape=jax.ShapeDtypeStruct((Np8, Op), jnp.float32),
            compiler_params=pltpu.CompilerParams(
                dimension_semantics=("arbitrary",),
                vmem_limit_bytes=vmem_limit),
            cost_estimate=cost,
        )(xp, w1p, b1p, gp, btp, w2p, b2p)
        return out_pad[:N, :D_out]

    # ---------------- two-pass tiled path ------------------------------------------
    # Adaptive batch tile: largest tile whose double-buffered tiles + whole weight
    # blocks fit under the scoped-VMEM limit.
    row_align = 16 if h_dtype == jnp.bfloat16 else SUBLANE
    row_bytes = max(2 * (Dp * 4 + Hp * h_bytes),                 # pass 1: x in + h out
                    2 * (Hp * h_bytes + Op * 4))                 # pass 2: h in + out
    fixed_bytes = 4 * (Dp * Hp + Hp * Op + 4 * Hp + 2 * Op) + (2 << 20)
    avail = max(vmem_limit - fixed_bytes, row_bytes * row_align)
    tn_max = min(batch_tile,
                 max(row_align, (avail // row_bytes) // row_align * row_align))

    # Balanced tiles; the batch is padded by at most ~row_align*T rows.
    T = _cdiv(N, tn_max)
    tn = _round_up(_cdiv(N, T), row_align)
    Np = T * tn
    mask_from = (N // tn) if Np != N else None    # first tile containing padded rows

    xp = _pad2d(x, Np, Dp)

    # ---- pass 1: linear1 + relu + per-tile partial stats ("parallel" grid) ----
    cost1 = pl.CostEstimate(
        flops=2 * Np * Dp * Hp + 4 * Np * Hp,
        transcendentals=0,
        bytes_accessed=4 * (Np * Dp + Dp * Hp + Hp) + h_bytes * Np * Hp
                       + 8 * T * SUBLANE * Hp,
    )
    h_pad, psum, psq = pl.pallas_call(
        functools.partial(_pass1_kernel, n_valid=N, tile_n=tn,
                          mask_from=mask_from, mm_dtype=matmul_dtype),
        grid=(T,),
        in_specs=[
            pl.BlockSpec((tn, Dp), lambda i: (i, 0)),
            pl.BlockSpec((Dp, Hp), lambda i: (0, 0)),
            pl.BlockSpec((1, Hp), lambda i: (0, 0)),
        ],
        out_specs=[
            pl.BlockSpec((tn, Hp), lambda i: (i, 0)),
            pl.BlockSpec((SUBLANE, Hp), lambda i: (i, 0)),       # per-tile partial sum
            pl.BlockSpec((SUBLANE, Hp), lambda i: (i, 0)),       # per-tile partial sumsq
        ],
        out_shape=[
            jax.ShapeDtypeStruct((Np, Hp), h_dtype),             # bf16 h when requested
            jax.ShapeDtypeStruct((T * SUBLANE, Hp), jnp.float32),
            jax.ShapeDtypeStruct((T * SUBLANE, Hp), jnp.float32),
        ],
        compiler_params=pltpu.CompilerParams(
            dimension_semantics=("parallel",),                   # shards across TCs on v7x
            vmem_limit_bytes=vmem_limit),
        cost_estimate=cost1,
    )(xp, w1p, b1p)

    # ---- tiny XLA epilogue: reduce partials, fold BN into Linear2 ----
    psum = psum.reshape(T, SUBLANE, Hp)[:, 0, :]                 # (T, Hp)
    psq = psq.reshape(T, SUBLANE, Hp)[:, 0, :]
    inv_n = jnp.float32(1.0 / N)
    mean = jnp.sum(psum, axis=0, keepdims=True) * inv_n          # (1, Hp)
    var = jnp.sum(psq, axis=0, keepdims=True) * inv_n - mean * mean
    var = jnp.maximum(var, 0.0)
    scale = gp * lax.rsqrt(var + BN_EPS)                         # (1, Hp)
    shift = btp - mean * scale                                   # (1, Hp)
    w2f = w2p * scale.T                                          # (Hp, Op) BN folded into W2
    b2f = jnp.dot(shift, w2p, precision=jax.lax.Precision.HIGHEST) + b2p   # (1, Op)

    # ---- pass 2: folded matmul + bias + sigmoid ("parallel" grid) ----
    cost2 = pl.CostEstimate(
        flops=2 * Np * Hp * Op,
        transcendentals=Np * Op,
        bytes_accessed=h_bytes * Np * Hp + 4 * (Hp * Op + Op + Np * Op),
    )
    out_pad = pl.pallas_call(
        functools.partial(_pass2_kernel, mm_dtype=matmul_dtype),
        grid=(T,),
        in_specs=[
            pl.BlockSpec((tn, Hp), lambda i: (i, 0)),
            pl.BlockSpec((Hp, Op), lambda i: (0, 0)),
            pl.BlockSpec((1, Op), lambda i: (0, 0)),
        ],
        out_specs=pl.BlockSpec((tn, Op), lambda i: (i, 0)),      # lane-dense output slab
        out_shape=jax.ShapeDtypeStruct((Np, Op), jnp.float32),
        compiler_params=pltpu.CompilerParams(
            dimension_semantics=("parallel",),
            vmem_limit_bytes=vmem_limit),
        cost_estimate=cost2,
    )(h_pad, w2f, b2f)

    return out_pad[:N, :D_out]


# ---------------------------------------------------------------------------
# Params / reference
# ---------------------------------------------------------------------------
def init_params(key, D_in, H, D_out):
    """Mimic torch defaults (Linear: U(-1/sqrt(fan_in), +); BN: gamma=1, beta=0)."""
    k1, k2, k3, k4 = jax.random.split(key, 4)
    bound1 = 1.0 / (D_in ** 0.5)
    bound2 = 1.0 / (H ** 0.5)
    w1 = jax.random.uniform(k1, (D_in, H), jnp.float32, -bound1, bound1)
    b1 = jax.random.uniform(k2, (H,), jnp.float32, -bound1, bound1)
    w2 = jax.random.uniform(k3, (H, D_out), jnp.float32, -bound2, bound2)
    b2 = jax.random.uniform(k4, (D_out,), jnp.float32, -bound2, bound2)
    gamma = jnp.ones((H,), jnp.float32)
    beta = jnp.zeros((H,), jnp.float32)
    return w1, b1, gamma, beta, w2, b2


def reference_forward(x, w1, b1, gamma, beta, w2, b2):
    hp = jax.lax.Precision.HIGHEST
    h = jnp.maximum(jnp.dot(x, w1, precision=hp) + b1, 0.0)
    mean = jnp.mean(h, axis=0, keepdims=True)
    var = jnp.mean((h - mean) ** 2, axis=0, keepdims=True)
    hn = (h - mean) / jnp.sqrt(var + BN_EPS) * gamma + beta
    return jax.nn.sigmoid(jnp.dot(hn, w2, precision=hp) + b2)


if __name__ == "__main__":
    N, D_in, H, D_out = 8, 16, 32, 4

    key = jax.random.PRNGKey(0)
    kx, kp = jax.random.split(key)
    x = jax.random.normal(kx, (N, D_in), jnp.float32)
    params = init_params(kp, D_in, H, D_out)
    ref = reference_forward(x, *params)

    # 1) fused single-kernel path (default for small shapes), f32 MXU.
    out = jax.block_until_ready(simple_logistic_forward(x, *params))
    assert out.shape == (N, D_out)
    assert jnp.allclose(out, ref, atol=1e-4, rtol=1e-4)

    # 2) two-pass tiled path (forced) at the same shape, f32 MXU.
    out2 = jax.block_until_ready(
        simple_logistic_forward(x, *params, force_two_pass=True))
    assert jnp.allclose(out2, ref, atol=1e-4, rtol=1e-4)

    # 3) two-pass path with several batch tiles and a masked ragged last tile.
    N3, D3, H3, O3 = 300, 70, 200, 3
    k3x, k3p = jax.random.split(jax.random.PRNGKey(1))
    x3 = jax.random.normal(k3x, (N3, D3), jnp.float32)
    p3 = init_params(k3p, D3, H3, O3)
    ref3 = reference_forward(x3, *p3)
    out3 = jax.block_until_ready(
        simple_logistic_forward(x3, *p3, batch_tile=128, force_two_pass=True))
    assert out3.shape == (N3, O3)
    assert jnp.allclose(out3, ref3, atol=1e-4, rtol=1e-4)

    # 4) bf16 MXU operands (fast path on v6e/v7x): fused and two-pass (bf16 h store).
    out_bf = jax.block_until_ready(
        simple_logistic_forward(x, *params, matmul_dtype=jnp.bfloat16))
    assert jnp.allclose(out_bf, ref, atol=5e-2, rtol=5e-2)
    out_bf2 = jax.block_until_ready(
        simple_logistic_forward(x, *params, matmul_dtype=jnp.bfloat16,
                                force_two_pass=True))
    assert jnp.allclose(out_bf2, ref, atol=5e-2, rtol=5e-2)

    print("KERNEL_OK")
</pallas_src>

<mosaic_0001>
module attributes {stable_mosaic.version = 11 : i64} {
  func.func @_fused_kernel(%arg0: i32, %arg1: memref<8x128xf32, #tpu.memory_space<vmem>>, %arg2: memref<128x128xf32, #tpu.memory_space<vmem>>, %arg3: memref<1x128xf32, #tpu.memory_space<vmem>>, %arg4: memref<1x128xf32, #tpu.memory_space<vmem>>, %arg5: memref<1x128xf32, #tpu.memory_space<vmem>>, %arg6: memref<128x128xf32, #tpu.memory_space<vmem>>, %arg7: memref<1x128xf32, #tpu.memory_space<vmem>>, %arg8: memref<8x128xf32, #tpu.memory_space<vmem>>) attributes {dimension_semantics = [#tpu.dimension_semantics<arbitrary>], iteration_bounds = array<i64: 1>, scalar_prefetch = 0 : i64, scratch_operands = 0 : i64, tpu.core_type = #tpu.core_type<tc>, window_params = [{pipeline_mode = #tpu.pipeline_mode<synchronous>, transform_indices = @transform_0, window_bounds = array<i64: 8, 128>}, {pipeline_mode = #tpu.pipeline_mode<synchronous>, transform_indices = @transform_1, window_bounds = array<i64: 128, 128>}, {pipeline_mode = #tpu.pipeline_mode<synchronous>, transform_indices = @transform_2, window_bounds = array<i64: 1, 128>}, {pipeline_mode = #tpu.pipeline_mode<synchronous>, transform_indices = @transform_3, window_bounds = array<i64: 1, 128>}, {pipeline_mode = #tpu.pipeline_mode<synchronous>, transform_indices = @transform_4, window_bounds = array<i64: 1, 128>}, {pipeline_mode = #tpu.pipeline_mode<synchronous>, transform_indices = @transform_5, window_bounds = array<i64: 128, 128>}, {pipeline_mode = #tpu.pipeline_mode<synchronous>, transform_indices = @transform_6, window_bounds = array<i64: 1, 128>}, {pipeline_mode = #tpu.pipeline_mode<synchronous>, transform_indices = @transform_7, window_bounds = array<i64: 8, 128>}]} {
    %c0 = arith.constant 0 : index
    %c0_0 = arith.constant 0 : index
    %0 = vector.load %arg1[%c0, %c0_0] : memref<8x128xf32, #tpu.memory_space<vmem>>, vector<8x128xf32>
    %c0_1 = arith.constant 0 : index
    %c0_2 = arith.constant 0 : index
    %1 = vector.load %arg2[%c0_1, %c0_2] : memref<128x128xf32, #tpu.memory_space<vmem>>, vector<128x128xf32>
    %cst = arith.constant dense<0.000000e+00> : vector<8x128xf32>
    %2 = tpu.matmul %0, %1, %cst {dimension_numbers = #tpu.dot_dimension_numbers<[1], [0], [0], [1], [0, 0, 1, 1], [], []>} : vector<8x128xf32>, vector<128x128xf32>, vector<8x128xf32> -> vector<8x128xf32>
    %c0_3 = arith.constant 0 : index
    %c0_4 = arith.constant 0 : index
    %3 = vector.load %arg3[%c0_3, %c0_4] : memref<1x128xf32, #tpu.memory_space<vmem>>, vector<1x128xf32>
    %4 = vector.broadcast %3 : vector<1x128xf32> to vector<8x128xf32>
    %5 = arith.addf %2, %4 : vector<8x128xf32>
    %cst_5 = arith.constant 0.000000e+00 : f32
    %6 = vector.broadcast %cst_5 : f32 to vector<8x128xf32>
    %7 = arith.maximumf %5, %6 : vector<8x128xf32>
    %cst_6 = arith.constant dense<0.000000e+00> : vector<128xf32>
    %8 = vector.multi_reduction <add>, %7, %cst_6 [0] : vector<8x128xf32> to vector<128xf32>
    %9 = vector.shape_cast %8 : vector<128xf32> to vector<1x128xf32>
    %cst_7 = arith.constant 1.250000e-01 : f32
    %10 = vector.broadcast %cst_7 : f32 to vector<1x128xf32>
    %11 = arith.mulf %9, %10 : vector<1x128xf32>
    %12 = arith.mulf %7, %7 : vector<8x128xf32>
    %cst_8 = arith.constant dense<0.000000e+00> : vector<128xf32>
    %13 = vector.multi_reduction <add>, %12, %cst_8 [0] : vector<8x128xf32> to vector<128xf32>
    %14 = vector.shape_cast %13 : vector<128xf32> to vector<1x128xf32>
    %cst_9 = arith.constant 1.250000e-01 : f32
    %15 = vector.broadcast %cst_9 : f32 to vector<1x128xf32>
    %16 = arith.mulf %14, %15 : vector<1x128xf32>
    %17 = arith.mulf %11, %11 : vector<1x128xf32>
    %18 = arith.subf %16, %17 : vector<1x128xf32>
    %cst_10 = arith.constant 0.000000e+00 : f32
    %19 = vector.broadcast %cst_10 : f32 to vector<1x128xf32>
    %20 = arith.maximumf %18, %19 : vector<1x128xf32>
    %c0_11 = arith.constant 0 : index
    %c0_12 = arith.constant 0 : index
    %21 = vector.load %arg4[%c0_11, %c0_12] : memref<1x128xf32, #tpu.memory_space<vmem>>, vector<1x128xf32>
    %cst_13 = arith.constant 9.99999974E-6 : f32
    %22 = vector.broadcast %cst_13 : f32 to vector<1x128xf32>
    %23 = arith.addf %20, %22 : vector<1x128xf32>
    %24 = math.rsqrt %23 : vector<1x128xf32>
    %25 = arith.mulf %21, %24 : vector<1x128xf32>
    %c0_14 = arith.constant 0 : index
    %c0_15 = arith.constant 0 : index
    %26 = vector.load %arg5[%c0_14, %c0_15] : memref<1x128xf32, #tpu.memory_space<vmem>>, vector<1x128xf32>
    %27 = arith.mulf %11, %25 : vector<1x128xf32>
    %28 = arith.subf %26, %27 : vector<1x128xf32>
    %29 = vector.broadcast %25 : vector<1x128xf32> to vector<8x128xf32>
    %30 = arith.mulf %7, %29 : vector<8x128xf32>
    %31 = vector.broadcast %28 : vector<1x128xf32> to vector<8x128xf32>
    %32 = arith.addf %30, %31 : vector<8x128xf32>
    %c0_16 = arith.constant 0 : index
    %c0_17 = arith.constant 0 : index
    %33 = vector.load %arg6[%c0_16, %c0_17] : memref<128x128xf32, #tpu.memory_space<vmem>>, vector<128x128xf32>
    %cst_18 = arith.constant dense<0.000000e+00> : vector<8x128xf32>
    %34 = tpu.matmul %32, %33, %cst_18 {dimension_numbers = #tpu.dot_dimension_numbers<[1], [0], [0], [1], [0, 0, 1, 1], [], []>} : vector<8x128xf32>, vector<128x128xf32>, vector<8x128xf32> -> vector<8x128xf32>
    %c0_19 = arith.constant 0 : index
    %c0_20 = arith.constant 0 : index
    %35 = vector.load %arg7[%c0_19, %c0_20] : memref<1x128xf32, #tpu.memory_space<vmem>>, vector<1x128xf32>
    %36 = vector.broadcast %35 : vector<1x128xf32> to vector<8x128xf32>
    %37 = arith.addf %34, %36 : vector<8x128xf32>
    %38 = arith.negf %37 : vector<8x128xf32>
    %39 = math.exp %38 : vector<8x128xf32>
    %cst_21 = arith.constant 1.000000e+00 : f32
    %40 = vector.broadcast %cst_21 : f32 to vector<8x128xf32>
    %41 = arith.addf %40, %39 : vector<8x128xf32>
    %42 = arith.divf %40, %41 : vector<8x128xf32>
    %c0_22 = arith.constant 0 : index
    %c0_23 = arith.constant 0 : index
    %43 = vector.load %arg8[%c0_22, %c0_23] : memref<8x128xf32, #tpu.memory_space<vmem>>, vector<8x128xf32>
    tpu.vector_store %arg8[%c0_22, %c0_23], %42 {strides = array<i32>} : memref<8x128xf32, #tpu.memory_space<vmem>>, vector<8x128xf32>,
    return
  }
  func.func @transform_0(%arg0: i32) -> (i32, i32) {
    %c0_i32 = arith.constant 0 : i32
    %c0_i32_0 = arith.constant 0 : i32
    %c0_i32_1 = arith.constant 0 : i32
    return %c0_i32, %c0_i32_0 : i32, i32
  }
  func.func @transform_1(%arg0: i32) -> (i32, i32) {
    %c0_i32 = arith.constant 0 : i32
    %c0_i32_0 = arith.constant 0 : i32
    %c0_i32_1 = arith.constant 0 : i32
    return %c0_i32, %c0_i32_0 : i32, i32
  }
  func.func @transform_2(%arg0: i32) -> (i32, i32) {
    %c0_i32 = arith.constant 0 : i32
    %c0_i32_0 = arith.constant 0 : i32
    %c0_i32_1 = arith.constant 0 : i32
    return %c0_i32, %c0_i32_0 : i32, i32
  }
  func.func @transform_3(%arg0: i32) -> (i32, i32) {
    %c0_i32 = arith.constant 0 : i32
    %c0_i32_0 = arith.constant 0 : i32
    %c0_i32_1 = arith.constant 0 : i32
    return %c0_i32, %c0_i32_0 : i32, i32
  }
  func.func @transform_4(%arg0: i32) -> (i32, i32) {
    %c0_i32 = arith.constant 0 : i32
    %c0_i32_0 = arith.constant 0 : i32
    %c0_i32_1 = arith.constant 0 : i32
    return %c0_i32, %c0_i32_0 : i32, i32
  }
  func.func @transform_5(%arg0: i32) -> (i32, i32) {
    %c0_i32 = arith.constant 0 : i32
    %c0_i32_0 = arith.constant 0 : i32
    %c0_i32_1 = arith.constant 0 : i32
    return %c0_i32, %c0_i32_0 : i32, i32
  }
  func.func @transform_6(%arg0: i32) -> (i32, i32) {
    %c0_i32 = arith.constant 0 : i32
    %c0_i32_0 = arith.constant 0 : i32
    %c0_i32_1 = arith.constant 0 : i32
    return %c0_i32, %c0_i32_0 : i32, i32
  }
  func.func @transform_7(%arg0: i32) -> (i32, i32) {
    %c0_i32 = arith.constant 0 : i32
    %c0_i32_0 = arith.constant 0 : i32
    %c0_i32_1 = arith.constant 0 : i32
    return %c0_i32, %c0_i32_0 : i32, i32
  }
}

</mosaic_0001>

<bundles_post_ra>
// kernel: tpu_custom_call.1
= control target key start
LH: loop header
LB: loop body
LE: loop exit
PB: predicated region body
PF: predicated region fallthrough
CT: control target
= control target key end

     0   :  { %12 = vsyncpa [#allocation3], 0  ;;  %s711_s0 = inlined_call_operand.hbm [shape: f32[8,128], index: 0, kind: input, shape index: {}]   ;;  %s712_s1 = inlined_call_operand.hbm [shape: f32[128,128], index: 1, kind: input, shape index: {}]   ;;  %s713_s2 = inlined_call_operand.vmem [shape: f32[1,128], index: 2, kind: input, shape index: {}]   ;;  %s714_s3 = inlined_call_operand.vmem [shape: f32[1,128], index: 3, kind: input, shape index: {}]   ;;  %s715_s4 = inlined_call_operand.vmem [shape: f32[1,128], index: 4, kind: input, shape index: {}]   ;;  %s716_s5 = inlined_call_operand.hbm [shape: f32[128,128], index: 5, kind: input, shape index: {}]   ;;  %s717_s6 = inlined_call_operand.vmem [shape: f32[1,128], index: 6, kind: input, shape index: {}]   ;;  %s718_s7 = inlined_call_operand.hbm [shape: f32[8,128], index: 7, kind: output, shape index: {}]  }
   0x1   :  { %13 = vsyncpa [#allocation6], 0 }
   0x2   :  { %14 = vsyncpa [#allocation4], 0  ;;  %s580_s24 = smov [#allocation5]   ;;  %s486_s28 = scalar_lea.hbm %s712_s1, 2048 }
   0x3   :  { %s30_s25 = sshll.u32 %s580_s24, 4  ;;  %p487_p0 = scmp.ne.s32.totalorder %s712_s1, %s486_s28  ;;  %s31_s25 = int_to_ptr.vmem [resolvable:$true] %s30_s25 }
   0x4   :  { %p490_p1 = scmp.lt.u32.totalorder %s486_s28, %s712_s1 }
   0x6   :  { %p492_p2 = pnand %p490_p1, %p487_p0 }
   0x8   :  { %495 = shalt.err (!%p492_p2)
}
   0x9   :  { %s496_s10 = scalar_lea.vmem %s31_s25, 2048  ;;  %p501_p4 = scmp.lt.s32.totalorder %s31_s25, %s31_s25 }
   0xa   :  { %p497_p3 = scmp.ne.s32.totalorder %s31_s25, %s496_s10  ;;  %p502_p5 = scmp.lt.s32.totalorder %s496_s10, %s496_s10 }
   0xc   :  { %p503_p6 = por %p502_p5, %p501_p4 }
   0xe   :  { %p504_p7 = pnand %p503_p6, %p497_p3 }
  0x10   :  { %507 = shalt.err (!%p504_p7)
}
  0x11   :  { %s581_s11 = smov 128   ;;  %s582_s12 = smov 8  }
  0x12   :  { %36 = dma.hbm_to_vmem [thread:$0]  %s712_s1, 2048, %s31_s25, [#allocation6], %s581_s11, %s581_s11, %s582_s12  }
  0x13   :  { %s583_s15 = smov [#allocation2]   ;;  %s584_s17 = smov [#allocation7]  }
  0x14   :  { %s21_s16 = sshll.u32 %s583_s15, 4  ;;  %s48_s18 = sshll.u32 %s584_s17, 4  ;;  %s22_s16 = int_to_ptr.vmem [resolvable:$true] %s21_s16  ;;  %s49_s18 = int_to_ptr.vmem [resolvable:$true] %s48_s18 }
  0x15   :  { %s508_s21 = scalar_lea.hbm %s711_s0, 128 }
  0x16   :  { %p509_p8 = scmp.ne.s32.totalorder %s711_s0, %s508_s21  ;;  %p512_p9 = scmp.lt.u32.totalorder %s508_s21, %s711_s0 }
  0x18   :  { %p514_p10 = pnand %p512_p9, %p509_p8 }
  0x1a   :  { %517 = shalt.err (!%p514_p10)
}
  0x1b   :  { %s518_s1 = scalar_lea.vmem %s22_s16, 128  ;;  %p523_p12 = scmp.lt.s32.totalorder %s22_s16, %s22_s16 }
  0x1c   :  { %p519_p11 = scmp.ne.s32.totalorder %s22_s16, %s518_s1  ;;  %p524_p13 = scmp.lt.s32.totalorder %s518_s1, %s518_s1 }
  0x1e   :  { %p525_p0 = por %p524_p13, %p523_p12 }
  0x20   :  { %p526_p1 = pnand %p525_p0, %p519_p11 }
  0x22   :  { %529 = shalt.err (!%p526_p1)
}
  0x23   :  { %24 = dma.hbm_to_vmem [thread:$0]  %s711_s0, 128, %s22_s16, [#allocation3]  }
  0x24   :  { %s530_s30 = scalar_lea.hbm %s716_s5, 2048 }
  0x25   :  { %p531_p2 = scmp.ne.s32.totalorder %s716_s5, %s530_s30  ;;  %p534_p3 = scmp.lt.u32.totalorder %s530_s30, %s716_s5 }
  0x27   :  { %p536_p4 = pnand %p534_p3, %p531_p2 }
  0x29   :  { %539 = shalt.err (!%p536_p4)
}
  0x2a   :  { %s540_s14 = scalar_lea.vmem %s49_s18, 2048  ;;  %p545_p6 = scmp.lt.s32.totalorder %s49_s18, %s49_s18 }
  0x2b   :  { %p541_p5 = scmp.ne.s32.totalorder %s49_s18, %s540_s14  ;;  %p546_p7 = scmp.lt.s32.totalorder %s540_s14, %s540_s14 }
  0x2d   :  { %p547_p8 = por %p546_p7, %p545_p6 }
  0x2f   :  { %p548_p9 = pnand %p547_p8, %p541_p5 }
  0x31   :  { %551 = shalt.err (!%p548_p9)
}
  0x32   :  { %54 = dma.hbm_to_vmem [thread:$0]  %s716_s5, 2048, %s49_s18, [#allocation6], %s581_s11, %s581_s11, %s582_s12  }
  0x33   :  { %574 = dma.done.wait [#allocation3], 128  }
  0x34   :  { %575 = vsyncadd [#allocation3], 4294967168 }
  0x35   :  { %576 = dma.done.wait [#allocation6], 4096  }
  0x36   :  { %577 = vsyncadd [#allocation6], 4294963200  ;;  %v585_v0 = vmov 0.0|0.0   ;;  %vm586_vm0 = vmmov 0   ;;  %v587_v1 = vmov 0.0   ;;  %v67_v2 = vld [vmem:[#allocation5] sm:$0xff] }
  0x37   :  { %423 = vmatprep.subr.bf16.mxu0 %v585_v0  ;;  %385 = vmatprep.mubr.msk.f32.mxu0 %vm586_vm0, %v587_v1  ;;  %v68_v3 = vld [vmem:[#allocation5 + $0x8] sm:$0xff]  ;;  %v69_v4 = vld [vmem:[#allocation5 + $0x10] sm:$0xff]  ;;  %v70_v6 = vld [vmem:[#allocation5 + $0x18] sm:$0xff] }
  0x38   :  { %447 = vmatprep.subr.bf16.mxu1 %v585_v0  ;;  %420 = vmatprep.mubr.msk.f32.mxu1 %vm586_vm0, %v587_v1  ;;  %v424_v5 = vpack.c.bf16 %v68_v3, %v67_v2  ;;  %v427_v7 = vpack.c.bf16 %v70_v6, %v69_v4  ;;  %v71_v8 = vld [vmem:[#allocation5 + $0x20] sm:$0xff]  ;;  %v72_v9 = vld [vmem:[#allocation5 + $0x28] sm:$0xff]  ;;  %v73_v11 = vld [vmem:[#allocation5 + $0x30] sm:$0xff] }
  0x39   :  { %v430_v10 = vpack.c.bf16 %v72_v9, %v71_v8  ;;  %v74_v12 = vld [vmem:[#allocation5 + $0x38] sm:$0xff]  ;;  %v75_v14 = vld [vmem:[#allocation5 + $0x40] sm:$0xff]  ;;  %v76_v15 = vld [vmem:[#allocation5 + $0x48] sm:$0xff] }
  0x3a   :  { %425 = vmatpush3.bf16.msra.mxu0 %v424_v5  ;;  %v433_v13 = vpack.c.bf16 %v74_v12, %v73_v11  ;;  %v436_v16 = vpack.c.bf16 %v76_v15, %v75_v14  ;;  %v77_v17 = vld [vmem:[#allocation5 + $0x50] sm:$0xff]  ;;  %v78_v18 = vld [vmem:[#allocation5 + $0x58] sm:$0xff]  ;;  %v79_v20 = vld [vmem:[#allocation5 + $0x60] sm:$0xff]  ;;  %v187_v11 = vlaneseq }
  0x3b   :  { %426 = vmatprep.subr.bf16.mxu0 %v585_v0  ;;  %v439_v19 = vpack.c.bf16 %v78_v18, %v77_v17  ;;  %v80_v21 = vld [vmem:[#allocation5 + $0x68] sm:$0xff]  ;;  %v81_v23 = vld [vmem:[#allocation5 + $0x70] sm:$0xff]  ;;  %v82_v24 = vld [vmem:[#allocation5 + $0x78] sm:$0xff] }
  0x3c   :  { %v442_v22 = vpack.c.bf16 %v80_v21, %v79_v20  ;;  %v445_v25 = vpack.c.bf16 %v82_v24, %v81_v23  ;;  %v66_v26 = vld [vmem:[#allocation2] sm:$0xff]  ;;  %v200_v27 = vld [vmem:[#allocation7] sm:$0xff]  ;;  %v201_v28 = vld [vmem:[#allocation7 + $0x8] sm:$0xff]  ;;  %v188_v12 = vshrl.u32 %v187_v11, 7 }
  0x3d   :  { %v448_v29 = vpack.c.bf16 %v201_v28, %v200_v27  ;;  %v202_v30 = vld [vmem:[#allocation7 + $0x10] sm:$0xff]  ;;  %v203_v31 = vld [vmem:[#allocation7 + $0x18] sm:$0xff]  ;;  %v204_v33 = vld [vmem:[#allocation7 + $0x20] sm:$0xff] }
  0x3e   :  { %428 = vmatpush3.bf16.msra.mxu0 %v427_v7  ;;  %v451_v32 = vpack.c.bf16 %v203_v31, %v202_v30  ;;  %v205_v34 = vld [vmem:[#allocation7 + $0x28] sm:$0xff]  ;;  %v206_v36 = vld [vmem:[#allocation7 + $0x30] sm:$0xff]  ;;  %v207_v37 = vld [vmem:[#allocation7 + $0x38] sm:$0xff]  ;;  %v189_v14 = vsub.s32 0, %v188_v12 }
  0x3f   :  { %429 = vmatprep.subr.bf16.mxu0 %v585_v0  ;;  %449 = vmatpush3.bf16.msra.mxu1 %v448_v29  ;;  %v454_v35 = vpack.c.bf16 %v205_v34, %v204_v33  ;;  %v457_v38 = vpack.c.bf16 %v207_v37, %v206_v36  ;;  %v208_v39 = vld [vmem:[#allocation7 + $0x40] sm:$0xff]  ;;  %v209_v40 = vld [vmem:[#allocation7 + $0x48] sm:$0xff]  ;;  %v210_v42 = vld [vmem:[#allocation7 + $0x50] sm:$0xff] }
  0x40   :  { %450 = vmatprep.subr.bf16.mxu1 %v585_v0  ;;  %v460_v41 = vpack.c.bf16 %v209_v40, %v208_v39  ;;  %v211_v43 = vld [vmem:[#allocation7 + $0x58] sm:$0xff]  ;;  %v212_v45 = vld [vmem:[#allocation7 + $0x60] sm:$0xff]  ;;  %v213_v46 = vld [vmem:[#allocation7 + $0x68] sm:$0xff] }
  0x41   :  { %v463_v44 = vpack.c.bf16 %v211_v43, %v210_v42  ;;  %v466_v47 = vpack.c.bf16 %v213_v46, %v212_v45  ;;  %v214_v48 = vld [vmem:[#allocation7 + $0x70] sm:$0xff]  ;;  %v215_v49 = vld [vmem:[#allocation7 + $0x78] sm:$0xff] }
  0x42   :  { %431 = vmatpush3.bf16.msra.mxu0 %v430_v10  ;;  %v469_v50 = vpack.c.bf16 %v215_v49, %v214_v48  ;;  %v316_v51 = vld [vmem:[%s713_s2] ss:$0 sm:$0xff] }
  0x43   :  { %432 = vmatprep.subr.bf16.mxu0 %v585_v0  ;;  %452 = vmatpush3.bf16.msra.mxu1 %v451_v32  ;;  %v183_v17 = vld [vmem:[%s715_s4] sm:$0x1] }
  0x44   :  { %453 = vmatprep.subr.bf16.mxu1 %v585_v0  ;;  %v317_v24 = vld [vmem:[%s717_s6] ss:$0 sm:$0xff] }
  0x46   :  { %434 = vmatpush3.bf16.msra.mxu0 %v433_v13  ;;  %v179_v13 = vld [vmem:[%s714_s3] sm:$0x1]  ;;  %s588_s3 = smov [#allocation8]  }
  0x47   :  { %435 = vmatprep.subr.bf16.mxu0 %v585_v0  ;;  %455 = vmatpush3.bf16.msra.mxu1 %v454_v35  ;;  %s306_s4 = sshll.u32 %s588_s3, 4  ;;  %s307_s4 = int_to_ptr.vmem [resolvable:$true] %s306_s4 }
  0x48   :  { %456 = vmatprep.subr.bf16.mxu1 %v585_v0  ;;  %s552_s20 = scalar_lea.vmem %s307_s4, 128  ;;  %p557_p11 = scmp.lt.s32.totalorder %s307_s4, %s307_s4 }
  0x49   :  { %p553_p10 = scmp.ne.s32.totalorder %s307_s4, %s552_s20  ;;  %p558_p12 = scmp.lt.s32.totalorder %s552_s20, %s552_s20 }
  0x4a   :  { %437 = vmatpush3.bf16.msra.mxu0 %v436_v16 }
  0x4b   :  { %438 = vmatprep.subr.bf16.mxu0 %v585_v0  ;;  %458 = vmatpush3.bf16.msra.mxu1 %v457_v38  ;;  %p559_p13 = por %p558_p12, %p557_p11 }
  0x4c   :  { %459 = vmatprep.subr.bf16.mxu1 %v585_v0 }
  0x4d   :  { %p560_p0 = pnand %p559_p13, %p553_p10 }
  0x4e   :  { %440 = vmatpush3.bf16.msra.mxu0 %v439_v19 }
  0x4f   :  { %441 = vmatprep.subr.bf16.mxu0 %v585_v0  ;;  %461 = vmatpush3.bf16.msra.mxu1 %v460_v41 }
  0x50   :  { %462 = vmatprep.subr.bf16.mxu1 %v585_v0 }
  0x52   :  { %443 = vmatpush3.bf16.msra.mxu0 %v442_v22 }
  0x53   :  { %444 = vmatprep.subr.bf16.mxu0 %v585_v0  ;;  %464 = vmatpush3.bf16.msra.mxu1 %v463_v44 }
  0x54   :  { %465 = vmatprep.subr.bf16.mxu1 %v585_v0 }
  0x56   :  { %446 = vmatpush3.bf16.msra.mxu0 %v445_v25 }
  0x57   :  { %467 = vmatpush3.bf16.msra.mxu1 %v466_v47 }
  0x58   :  { %468 = vmatprep.subr.bf16.mxu1 %v585_v0 }
  0x59   :  { %386 = vmatmul.mubr.f32.vlgmr.msra.gmra.mrb[0].mxu0 %v66_v26 }
  0x5b   :  { %470 = vmatpush3.bf16.msra.mxu1 %v469_v50 }
 0x12c   :  { %v156_v52 = vpop.f32.mrb[0].mxu0 }
 0x12d   :  { %v157_v53 = vadd.f32 %v316_v51, %v156_v52  ;;  %v387_v54 = vpop.f32.mrb[1].mxu0 }
 0x12f   :  { %v160_v55 = vmax.f32 %v157_v53, 0.0 }
 0x131   :  { %v161_v56 = vrot.slane %v160_v55, 4  ;;  %v168_v57 = vmul.f32 %v160_v55, %v160_v55 }
 0x133   :  { %v162_v58 = vadd.f32 %v161_v56, %v160_v55  ;;  %v169_v59 = vrot.slane %v168_v57, 4 }
 0x135   :  { %v163_v60 = vrot.slane %v162_v58, 2  ;;  %v170_v61 = vadd.f32 %v169_v59, %v168_v57 }
 0x137   :  { %v164_v62 = vadd.f32 %v163_v60, %v162_v58  ;;  %v171_v63 = vrot.slane %v170_v61, 2 }
 0x139   :  { %v165_v1 = vrot.slane %v164_v62, 1  ;;  %v172_v2 = vadd.f32 %v171_v63, %v170_v61 }
 0x13b   :  { %v173_v0 = vrot.slane %v172_v2, 1  ;;  %v166_v3 = vadd.f32 %v165_v1, %v164_v62 }
 0x13d   :  { %v174_v4 = vadd.f32 %v173_v0, %v172_v2  ;;  %v167_v5 = vmul.f32 0.125, %v166_v3 }
 0x13f   :  { %v175_v6 = vmul.f32 0.125, %v174_v4  ;;  %v176_v7 = vmul.f32 %v167_v5, %v167_v5 }
 0x141   :  { %v177_v8 = vsub.f32 %v175_v6, %v176_v7 }
 0x143   :  { %v178_v9 = vmax.f32 %v177_v8, 0.0 }
 0x145   :  { %v180_v10 = vadd.f32 1e-05, %v178_v9 }
 0x147   :  { %480 = vrsqrt.f32 %v180_v10 }
 0x151   :  { %v481_v15 = vpop.eup %480 }
 0x152   :  { %v182_v16 = vmul.f32 %v481_v15, %v179_v13 }
 0x154   :  { %v184_v18 = vmul.f32 %v182_v16, %v167_v5  ;;  %v190_v19 = vrot.slane %v182_v16, %v189_v14 }
 0x156   :  { %v185_v20 = vsub.f32 %v183_v17, %v184_v18  ;;  %v192_v21 = vmul.f32 %v190_v19, %v160_v55 }
 0x158   :  { %v197_v22 = vrot.slane %v185_v20, %v189_v14 }
 0x15a   :  { %v199_v23 = vadd.f32 %v197_v22, %v192_v21 }
 0x15c   :  { %421 = vmatmul.mubr.f32.vlgmr.msra.gmra.mrb[0].mxu1 %v199_v23 }
 0x22f   :  { %v289_v25 = vpop.f32.mrb[0].mxu1 }
 0x230   :  { %v290_v26 = vadd.f32 %v317_v24, %v289_v25  ;;  %v422_v27 = vpop.f32.mrb[1].mxu1 }
 0x232   :  { %v318_v28 = vmul.f32 -1.442695, %v290_v26 }
 0x234   :  { %482 = vpow2.f32 %v318_v28 }
 0x23e   :  { %v483_v29 = vpop.eup %482 }
 0x23f   :  { %v296_v30 = vadd.f32 1.0, %v483_v29 }
 0x241   :  { %484 = vrcp.f32 %v296_v30 }
 0x24b   :  { %v485_v31 = vpop.eup %484 }
 0x24c   :  { %299 = vst [vmem:[#allocation8] sm:$0xff] %v485_v31 }
 0x24d   :  { %563 = shalt.err (!%p560_p0)
}
 0x24e   :  { %s564_s22 = scalar_lea.hbm %s718_s7, 128 }
 0x24f   :  { %p565_p1 = scmp.ne.s32.totalorder %s718_s7, %s564_s22  ;;  %p568_p2 = scmp.lt.u32.totalorder %s564_s22, %s718_s7 }
 0x251   :  { %p570_p3 = pnand %p568_p2, %p565_p1 }
 0x253   :  { %573 = shalt.err (!%p570_p3)
}
 0x254   :  { %309 = dma.vmem_to_hbm [thread:$0]  %s307_s4, 128, %s718_s7, [#allocation4]  }
 0x255   :  { %578 = dma.done.wait [#allocation4], 128  }
 0x256   :  { %579 = vsyncadd [#allocation4], 4294967168 }
 0x257   :  { %313 = vsyncpa [#allocation3], 1 }
 0x258   :  { %314 = vsyncpa [#allocation6], 1 }
 0x259   :  { %315 = vsyncpa [#allocation4], 1 }

</bundles_post_ra>
